<compile_context>
chip_gen: v6e
topology: v6e:2x2x1
jax: 0.10.0
libtpu: 0.0.40
codegen_flags: <defaults>
</compile_context>

<pallas_src>
import functools

import numpy as np
import jax
import jax.numpy as jnp
from jax.experimental import pallas as pl
from jax.experimental.pallas import tpu as pltpu

LANES = 128
MAX_TILE_PIX = 16384   # capped (~16K px) so double-buffered inputs + temporaries stay well under
                       # the 32 MiB scoped-VMEM default even on v7x (64 MiB physical).
NEG_INF = -1e30


def _tree_sum(parts):
    """Pairwise (tree) sum of a list of arrays — exposes ILP for the 4 VALU slots."""
    parts = list(parts)
    while len(parts) > 1:
        nxt = [parts[i] + parts[i + 1] for i in range(0, len(parts) - 1, 2)]
        if len(parts) % 2:
            nxt.append(parts[-1])
        parts = nxt
    return parts[0]


def _lane_fold(a, tile):
    """(CPAD, tile) -> (CPAD, 128): tree-sum of 128-lane groups (vreg-aligned VPU adds)."""
    return _tree_sum([a[:, off:off + LANES] for off in range(0, tile, LANES)])


def _loss_stats_kernel(x_ref, t_ref, out_ref, *, n_new, cpad, fg_labels, tile):
    """Per-(batch, chunk, pixel-tile) accumulation of dice / CE statistics.

    out_ref (4, CPAD, 128) f32, accumulated over the pixel-tile grid axis:
      slab 0: per-class sum of softmax prob at target class   (-> tp)
      slab 1: per-class sum of softmax prob                    (-> fp = slab1 - tp)
      slab 2: per-class count of target == class               (-> fn = slab2 - tp)
      slab 3: per-class sum of -log softmax at target class    (-> CE total)
    The 128 lanes hold lane-group partial sums; the final reduction over batch / chunk /
    classes / lanes happens in the (tiny) wrapper epilogue.
    """
    @pl.when(pl.program_id(2) == 0)
    def _():
        out_ref[...] = jnp.zeros_like(out_ref)

    x = x_ref[...]                                      # (C, tile) native dtype, pixels on lanes
    num_ch = x.shape[0]

    # Static 0/1 merge matrix built in-kernel (one partial vreg of work): row 0 = SUM of the
    # merged classes, row i+1 gathers original channel fg_labels[i]; channels >= 15 excluded.
    row = jax.lax.broadcasted_iota(jnp.int32, (cpad, num_ch), 0)
    col = jax.lax.broadcasted_iota(jnp.int32, (cpad, num_ch), 1)
    rowmap = _tree_sum([jnp.where(col == lab, jnp.int32(i + 1), jnp.int32(0))
                        for i, lab in enumerate(fg_labels)])
    m = jnp.where((row == rowmap) & (col < 15), 1.0, 0.0).astype(x.dtype)

    # channel merge: one tiny (cpad, C) x (C, tile) MXU matmul with f32 accumulation
    logits = jnp.dot(m, x, preferred_element_type=jnp.float32)     # (cpad, tile)

    # disable padded class rows: select on the (cpad, 1) column, broadcast add over the tile
    rowvec = jax.lax.broadcasted_iota(jnp.int32, (cpad, 1), 0)
    logits = logits + jnp.where(rowvec < n_new, 0.0, NEG_INF)

    # softmax / log-softmax over the (sublane) class axis; reciprocal hoisted to the (1,tile) row
    mx = jnp.max(logits, axis=0, keepdims=True)         # (1, tile)
    sh = logits - mx
    ex = jnp.exp(sh)                                    # EUP, (cpad, tile)
    se = jnp.sum(ex, axis=0, keepdims=True)             # (1, tile)
    inv_se = 1.0 / se                                   # exact divide, one row only
    p = ex * inv_se                                     # VPU mul, (cpad, tile)
    neg_logp = jnp.log(se) - sh                         # -log softmax, finite on pad rows

    # in-kernel label remap: partial_type[i] -> i+1 (and 14 -> len+1); rest (incl. 255) -> 0.
    # Sum of disjoint terms instead of a chained-select dependence chain.
    t = t_ref[...].astype(jnp.int32)                    # (1, tile), native dtype in, cast once
    new_t = _tree_sum([jnp.where(t == lab, jnp.int32(i + 1), jnp.int32(0))
                       for i, lab in enumerate(fg_labels)])
    cls = jax.lax.broadcasted_iota(jnp.int32, (cpad, tile), 0)
    onehot = (cls == new_t).astype(jnp.float32)         # (cpad, tile)

    out_ref[0, :, :] = out_ref[0, :, :] + _lane_fold(p * onehot, tile)
    out_ref[1, :, :] = out_ref[1, :, :] + _lane_fold(p, tile)
    out_ref[2, :, :] = out_ref[2, :, :] + _lane_fold(onehot, tile)
    out_ref[3, :, :] = out_ref[3, :, :] + _lane_fold(neg_logp * onehot, tile)


def _merge_setup(partial_type):
    partial_type = list(partial_type)
    fg_labels = partial_type + ([14] if 14 not in partial_type else [])
    n_new = 1 + len(fg_labels)
    cpad = 8 if n_new <= 8 else 16
    return tuple(fg_labels), n_new, cpad


def dc_ce_partial_mergeprob_loss_avg(net_output, target, partial_type,
                                     smooth=1e-5, do_bg=False, aggregate="sum"):
    """Forward of DC_CE_Partial_MergeProb_loss_avg (merge path, len(partial_type) < 13)."""
    assert len(partial_type) < 13, "only the merged-prediction path is implemented"
    B, C, H, W = net_output.shape
    assert C >= 15
    hw = H * W
    assert hw % LANES == 0, "H*W must be a multiple of 128"
    # TODO(synk): ragged H*W (not a multiple of 128) would need in-kernel lane masking.

    # Guarantee a >=2-way "parallel" grid axis (v7x: 2 TensorCores/chip) even when B == 1.
    nchunk = 2 if hw % (2 * LANES) == 0 else 1
    chunk_pix = hw // nchunk
    tile = min(MAX_TILE_PIX, chunk_pix)
    while chunk_pix % tile != 0:
        tile -= LANES
    tiles_per_chunk = chunk_pix // tile

    fg_labels, n_new, cpad = _merge_setup(partial_type)

    # free metadata reshapes only — no transpose, no dtype cast, no gather in the wrapper
    x = net_output.reshape(B, C, hw)
    t = target.reshape(B, 1, hw)

    kernel = functools.partial(_loss_stats_kernel, n_new=n_new, cpad=cpad,
                               fg_labels=fg_labels, tile=tile)

    x_bytes = jnp.dtype(net_output.dtype).itemsize
    t_bytes = jnp.dtype(target.dtype).itemsize
    cost = pl.CostEstimate(
        flops=int(2 * B * hw * C * cpad + 16 * B * hw * cpad),
        transcendentals=int(B * hw * (cpad + 2)),
        bytes_accessed=int(B * hw * (C * x_bytes + t_bytes)
                           + B * nchunk * 4 * cpad * LANES * 4))

    stats = pl.pallas_call(
        kernel,
        out_shape=jax.ShapeDtypeStruct((B, nchunk, 4, cpad, LANES), jnp.float32),
        grid_spec=pltpu.PrefetchScalarGridSpec(
            num_scalar_prefetch=0,
            grid=(B, nchunk, tiles_per_chunk),
            in_specs=[
                pl.BlockSpec((None, C, tile),                       # logits tile (C, tile)
                             lambda b, c, j: (b, 0, c * tiles_per_chunk + j)),
                pl.BlockSpec((None, 1, tile),                       # raw target tile
                             lambda b, c, j: (b, 0, c * tiles_per_chunk + j)),
            ],
            out_specs=pl.BlockSpec((None, None, 4, cpad, LANES),
                                   lambda b, c, j: (b, c, 0, 0, 0)),
        ),
        compiler_params=pltpu.CompilerParams(
            dimension_semantics=("parallel", "parallel", "arbitrary")),
        cost_estimate=cost,
    )(x, t)

    # tiny epilogue: reduce per-batch / per-chunk / per-lane partial sums
    per_class = jnp.sum(stats, axis=(0, 1, 4))          # (4, cpad)
    tp = per_class[0, :n_new]
    fp = per_class[1, :n_new] - tp
    fn = per_class[2, :n_new] - tp
    ce_total = jnp.sum(per_class[3])

    # SoftDiceLoss (batch_dice=True, do_bg=False)
    nominator = 2.0 * tp + smooth
    denominator = 2.0 * tp + fp + fn + smooth
    dc = nominator / (denominator + 1e-8)
    if not do_bg:
        dc = dc[1:]
    dc_loss = -jnp.mean(dc)

    # RobustCrossEntropyLoss: ignore_index never triggers after the remap (255 -> background)
    ce_loss = ce_total / float(B * hw)

    if aggregate == "sum":
        return ce_loss + dc_loss
    elif aggregate == "ce":
        return ce_loss
    elif aggregate == "dc":
        return dc_loss
    else:
        raise NotImplementedError("nah son")


def _reference_loss(net_output, target, partial_type, smooth=1e-5, do_bg=False):
    """Pure-JAX reference of the same forward semantics (for validation)."""
    B, C, H, W = net_output.shape
    partial_type = list(partial_type)
    merge_classes = [c for c in range(14) if c not in partial_type]
    fg_labels = partial_type + ([14] if 14 not in partial_type else [])
    n_new = 1 + len(fg_labels)

    x = net_output.astype(jnp.float32)
    bg = jnp.sum(x[:, np.array(merge_classes)], axis=1, keepdims=True)
    merged = jnp.concatenate([bg, x[:, np.array(fg_labels)]], axis=1)   # (B, n_new, H, W)

    t = target.reshape(B, H, W).astype(jnp.int32)
    new_t = jnp.zeros_like(t)
    for i, lab in enumerate(fg_labels):
        new_t = jnp.where(t == lab, i + 1, new_t)

    probs = jax.nn.softmax(merged, axis=1)
    onehot = (new_t[:, None, :, :] ==
              jnp.arange(n_new)[None, :, None, None]).astype(jnp.float32)
    tp = jnp.sum(probs * onehot, axis=(0, 2, 3))
    fp = jnp.sum(probs * (1.0 - onehot), axis=(0, 2, 3))
    fn = jnp.sum((1.0 - probs) * onehot, axis=(0, 2, 3))
    dc = (2.0 * tp + smooth) / (2.0 * tp + fp + fn + smooth + 1e-8)
    if not do_bg:
        dc = dc[1:]
    dc_loss = -jnp.mean(dc)

    logp = jax.nn.log_softmax(merged, axis=1)
    ce_loss = jnp.mean(-jnp.sum(logp * onehot, axis=1))
    return ce_loss + dc_loss


if __name__ == "__main__":
    key = jax.random.PRNGKey(0)
    k1, k2, k3 = jax.random.split(key, 3)

    B, C, H, W = 2, 15, 16, 16
    partial_type = [1, 5, 9]

    net_output = jax.random.normal(k1, (B, C, H, W), dtype=jnp.float32)
    target = jax.random.randint(k2, (B, 1, H, W), 0, 15, dtype=jnp.int32)
    # sprinkle some ignore-label pixels (remapped to background, matching PyTorch)
    ignore_mask = jax.random.uniform(k3, (B, 1, H, W)) < 0.05
    target = jnp.where(ignore_mask, jnp.int32(255), target)

    # f32 activations
    loss = jax.block_until_ready(
        dc_ce_partial_mergeprob_loss_avg(net_output, target, partial_type))
    ref = jax.block_until_ready(_reference_loss(net_output, target, partial_type))
    np.testing.assert_allclose(np.asarray(loss), np.asarray(ref), rtol=1e-4, atol=1e-5)

    # bf16 activations (native MXU dtype; halves the dominant HBM stream)
    net_bf16 = net_output.astype(jnp.bfloat16)
    loss_bf = jax.block_until_ready(
        dc_ce_partial_mergeprob_loss_avg(net_bf16, target, partial_type))
    ref_bf = jax.block_until_ready(_reference_loss(net_bf16, target, partial_type))
    np.testing.assert_allclose(np.asarray(loss_bf), np.asarray(ref_bf), rtol=1e-3, atol=1e-4)

    print("KERNEL_OK")
</pallas_src>

<mosaic_0001>
module attributes {stable_mosaic.version = 11 : i64} {
  func.func @_loss_stats_kernel(%arg0: i32, %arg1: i32, %arg2: i32, %arg3: memref<1x15x128xf32, #tpu.memory_space<vmem>>, %arg4: memref<1x1x128xi32, #tpu.memory_space<vmem>>, %arg5: memref<1x1x4x8x128xf32, #tpu.memory_space<vmem>>) attributes {dimension_semantics = [#tpu.dimension_semantics<parallel>, #tpu.dimension_semantics<parallel>, #tpu.dimension_semantics<arbitrary>], iteration_bounds = array<i64: 2, 2, 1>, scalar_prefetch = 0 : i64, scratch_operands = 0 : i64, tpu.core_type = #tpu.core_type<tc>, window_params = [{transform_indices = @transform_0, window_bounds = array<i64: 1, 15, 128>}, {transform_indices = @transform_1, window_bounds = array<i64: 1, 1, 128>}, {transform_indices = @transform_2, window_bounds = array<i64: 1, 1, 4, 8, 128>}]} {
    %c0_i32 = arith.constant 0 : i32
    %0 = arith.cmpi eq, %arg2, %c0_i32 : i32
    %1 = arith.extui %0 : i1 to i32
    %c0_i32_0 = arith.constant 0 : i32
    %2 = arith.cmpi ne, %1, %c0_i32_0 : i32
    scf.if %2 {
      %cst_68 = arith.constant 0.000000e+00 : f32
      %116 = vector.broadcast %cst_68 : f32 to vector<4x8x128xf32>
      %c0_69 = arith.constant 0 : index
      %c0_70 = arith.constant 0 : index
      %c0_71 = arith.constant 0 : index
      %c0_72 = arith.constant 0 : index
      %c0_73 = arith.constant 0 : index
      %117 = vector.load %arg5[%c0_69, %c0_70, %c0_71, %c0_72, %c0_73] : memref<1x1x4x8x128xf32, #tpu.memory_space<vmem>>, vector<1x1x4x8x128xf32>
      %118 = vector.shape_cast %117 : vector<1x1x4x8x128xf32> to vector<4x8x128xf32>
      %119 = vector.shape_cast %116 : vector<4x8x128xf32> to vector<1x1x4x8x128xf32>
      tpu.vector_store %arg5[%c0_69, %c0_70, %c0_71, %c0_72, %c0_73], %119 {strides = array<i32>} : memref<1x1x4x8x128xf32, #tpu.memory_space<vmem>>, vector<1x1x4x8x128xf32>,
    } else {
    }
    %c0 = arith.constant 0 : index
    %c0_1 = arith.constant 0 : index
    %c0_2 = arith.constant 0 : index
    %3 = vector.load %arg3[%c0, %c0_1, %c0_2] : memref<1x15x128xf32, #tpu.memory_space<vmem>>, vector<1x15x128xf32>
    %4 = vector.shape_cast %3 : vector<1x15x128xf32> to vector<15x128xf32>
    %5 = tpu.iota {dimensions = array<i32: 0>} : vector<8x15xi32>
    %6 = tpu.iota {dimensions = array<i32: 1>} : vector<8x15xi32>
    %c1_i32 = arith.constant 1 : i32
    %7 = vector.broadcast %c1_i32 : i32 to vector<8x15xi32>
    %8 = arith.cmpi eq, %6, %7 : vector<8x15xi32>
    %c1_i32_3 = arith.constant 1 : i32
    %c0_i32_4 = arith.constant 0 : i32
    %9 = vector.broadcast %c1_i32_3 : i32 to vector<8x15xi32>
    %10 = vector.broadcast %c0_i32_4 : i32 to vector<8x15xi32>
    %11 = arith.select %8, %9, %10 : vector<8x15xi1>, vector<8x15xi32>
    %c5_i32 = arith.constant 5 : i32
    %12 = vector.broadcast %c5_i32 : i32 to vector<8x15xi32>
    %13 = arith.cmpi eq, %6, %12 : vector<8x15xi32>
    %c2_i32 = arith.constant 2 : i32
    %c0_i32_5 = arith.constant 0 : i32
    %14 = vector.broadcast %c2_i32 : i32 to vector<8x15xi32>
    %15 = vector.broadcast %c0_i32_5 : i32 to vector<8x15xi32>
    %16 = arith.select %13, %14, %15 : vector<8x15xi1>, vector<8x15xi32>
    %c9_i32 = arith.constant 9 : i32
    %17 = vector.broadcast %c9_i32 : i32 to vector<8x15xi32>
    %18 = arith.cmpi eq, %6, %17 : vector<8x15xi32>
    %c3_i32 = arith.constant 3 : i32
    %c0_i32_6 = arith.constant 0 : i32
    %19 = vector.broadcast %c3_i32 : i32 to vector<8x15xi32>
    %20 = vector.broadcast %c0_i32_6 : i32 to vector<8x15xi32>
    %21 = arith.select %18, %19, %20 : vector<8x15xi1>, vector<8x15xi32>
    %c14_i32 = arith.constant 14 : i32
    %22 = vector.broadcast %c14_i32 : i32 to vector<8x15xi32>
    %23 = arith.cmpi eq, %6, %22 : vector<8x15xi32>
    %c4_i32 = arith.constant 4 : i32
    %c0_i32_7 = arith.constant 0 : i32
    %24 = vector.broadcast %c4_i32 : i32 to vector<8x15xi32>
    %25 = vector.broadcast %c0_i32_7 : i32 to vector<8x15xi32>
    %26 = arith.select %23, %24, %25 : vector<8x15xi1>, vector<8x15xi32>
    %27 = arith.addi %11, %16 : vector<8x15xi32>
    %28 = arith.addi %21, %26 : vector<8x15xi32>
    %29 = arith.addi %27, %28 : vector<8x15xi32>
    %30 = arith.cmpi eq, %5, %29 : vector<8x15xi32>
    %c15_i32 = arith.constant 15 : i32
    %31 = vector.broadcast %c15_i32 : i32 to vector<8x15xi32>
    %32 = arith.cmpi slt, %6, %31 : vector<8x15xi32>
    %33 = arith.andi %30, %32 : vector<8x15xi1>
    %cst = arith.constant 1.000000e+00 : f32
    %cst_8 = arith.constant 0.000000e+00 : f32
    %34 = vector.broadcast %cst : f32 to vector<8x15xf32>
    %35 = vector.broadcast %cst_8 : f32 to vector<8x15xf32>
    %36 = arith.select %33, %34, %35 : vector<8x15xi1>, vector<8x15xf32>
    %cst_9 = arith.constant dense<0.000000e+00> : vector<8x128xf32>
    %37 = tpu.matmul %36, %4, %cst_9 {dimension_numbers = #tpu.dot_dimension_numbers<[1], [0], [0], [1], [0, 0, 1, 1], [], []>} : vector<8x15xf32>, vector<15x128xf32>, vector<8x128xf32> -> vector<8x128xf32>
    %38 = tpu.iota {dimensions = array<i32: 0>} : vector<8x1xi32>
    %c5_i32_10 = arith.constant 5 : i32
    %39 = vector.broadcast %c5_i32_10 : i32 to vector<8x1xi32>
    %40 = arith.cmpi slt, %38, %39 : vector<8x1xi32>
    %cst_11 = arith.constant 0.000000e+00 : f32
    %cst_12 = arith.constant -1.000000e+30 : f32
    %41 = vector.broadcast %cst_11 : f32 to vector<8x1xf32>
    %42 = vector.broadcast %cst_12 : f32 to vector<8x1xf32>
    %43 = arith.select %40, %41, %42 : vector<8x1xi1>, vector<8x1xf32>
    %44 = vector.broadcast %43 : vector<8x1xf32> to vector<8x128xf32>
    %45 = arith.addf %37, %44 : vector<8x128xf32>
    %cst_13 = arith.constant dense<0xFF800000> : vector<128xf32>
    %46 = vector.multi_reduction <maximumf>, %45, %cst_13 [0] : vector<8x128xf32> to vector<128xf32>
    %47 = vector.shape_cast %46 : vector<128xf32> to vector<1x128xf32>
    %48 = vector.broadcast %47 : vector<1x128xf32> to vector<8x128xf32>
    %49 = arith.subf %45, %48 : vector<8x128xf32>
    %50 = math.exp %49 : vector<8x128xf32>
    %cst_14 = arith.constant dense<0.000000e+00> : vector<128xf32>
    %51 = vector.multi_reduction <add>, %50, %cst_14 [0] : vector<8x128xf32> to vector<128xf32>
    %52 = vector.shape_cast %51 : vector<128xf32> to vector<1x128xf32>
    %cst_15 = arith.constant 1.000000e+00 : f32
    %53 = vector.broadcast %cst_15 : f32 to vector<1x128xf32>
    %54 = arith.divf %53, %52 : vector<1x128xf32>
    %55 = vector.broadcast %54 : vector<1x128xf32> to vector<8x128xf32>
    %56 = arith.mulf %50, %55 : vector<8x128xf32>
    %57 = math.log %52 : vector<1x128xf32>
    %58 = vector.broadcast %57 : vector<1x128xf32> to vector<8x128xf32>
    %59 = arith.subf %58, %49 : vector<8x128xf32>
    %c0_16 = arith.constant 0 : index
    %c0_17 = arith.constant 0 : index
    %c0_18 = arith.constant 0 : index
    %60 = vector.load %arg4[%c0_16, %c0_17, %c0_18] : memref<1x1x128xi32, #tpu.memory_space<vmem>>, vector<1x1x128xi32>
    %61 = vector.shape_cast %60 : vector<1x1x128xi32> to vector<1x128xi32>
    %c1_i32_19 = arith.constant 1 : i32
    %62 = vector.broadcast %c1_i32_19 : i32 to vector<1x128xi32>
    %63 = arith.cmpi eq, %61, %62 : vector<1x128xi32>
    %c1_i32_20 = arith.constant 1 : i32
    %c0_i32_21 = arith.constant 0 : i32
    %64 = vector.broadcast %c1_i32_20 : i32 to vector<1x128xi32>
    %65 = vector.broadcast %c0_i32_21 : i32 to vector<1x128xi32>
    %66 = arith.select %63, %64, %65 : vector<1x128xi1>, vector<1x128xi32>
    %c5_i32_22 = arith.constant 5 : i32
    %67 = vector.broadcast %c5_i32_22 : i32 to vector<1x128xi32>
    %68 = arith.cmpi eq, %61, %67 : vector<1x128xi32>
    %c2_i32_23 = arith.constant 2 : i32
    %c0_i32_24 = arith.constant 0 : i32
    %69 = vector.broadcast %c2_i32_23 : i32 to vector<1x128xi32>
    %70 = vector.broadcast %c0_i32_24 : i32 to vector<1x128xi32>
    %71 = arith.select %68, %69, %70 : vector<1x128xi1>, vector<1x128xi32>
    %c9_i32_25 = arith.constant 9 : i32
    %72 = vector.broadcast %c9_i32_25 : i32 to vector<1x128xi32>
    %73 = arith.cmpi eq, %61, %72 : vector<1x128xi32>
    %c3_i32_26 = arith.constant 3 : i32
    %c0_i32_27 = arith.constant 0 : i32
    %74 = vector.broadcast %c3_i32_26 : i32 to vector<1x128xi32>
    %75 = vector.broadcast %c0_i32_27 : i32 to vector<1x128xi32>
    %76 = arith.select %73, %74, %75 : vector<1x128xi1>, vector<1x128xi32>
    %c14_i32_28 = arith.constant 14 : i32
    %77 = vector.broadcast %c14_i32_28 : i32 to vector<1x128xi32>
    %78 = arith.cmpi eq, %61, %77 : vector<1x128xi32>
    %c4_i32_29 = arith.constant 4 : i32
    %c0_i32_30 = arith.constant 0 : i32
    %79 = vector.broadcast %c4_i32_29 : i32 to vector<1x128xi32>
    %80 = vector.broadcast %c0_i32_30 : i32 to vector<1x128xi32>
    %81 = arith.select %78, %79, %80 : vector<1x128xi1>, vector<1x128xi32>
    %82 = arith.addi %66, %71 : vector<1x128xi32>
    %83 = arith.addi %76, %81 : vector<1x128xi32>
    %84 = arith.addi %82, %83 : vector<1x128xi32>
    %85 = tpu.iota {dimensions = array<i32: 0>} : vector<8x128xi32>
    %86 = vector.broadcast %84 : vector<1x128xi32> to vector<8x128xi32>
    %87 = arith.cmpi eq, %85, %86 : vector<8x128xi32>
    %88 = arith.extui %87 : vector<8x128xi1> to vector<8x128xi32>
    %89 = arith.sitofp %88 : vector<8x128xi32> to vector<8x128xf32>
    %c0_31 = arith.constant 0 : index
    %c0_32 = arith.constant 0 : index
    %c0_33 = arith.constant 0 : index
    %c0_34 = arith.constant 0 : index
    %c0_35 = arith.constant 0 : index
    %90 = vector.load %arg5[%c0_31, %c0_32, %c0_33, %c0_34, %c0_35] : memref<1x1x4x8x128xf32, #tpu.memory_space<vmem>>, vector<1x1x1x8x128xf32>
    %91 = vector.shape_cast %90 : vector<1x1x1x8x128xf32> to vector<8x128xf32>
    %92 = arith.mulf %56, %89 : vector<8x128xf32>
    %93 = arith.addf %91, %92 : vector<8x128xf32>
    %c0_36 = arith.constant 0 : index
    %c0_37 = arith.constant 0 : index
    %c0_38 = arith.constant 0 : index
    %c0_39 = arith.constant 0 : index
    %c0_40 = arith.constant 0 : index
    %94 = vector.load %arg5[%c0_36, %c0_37, %c0_38, %c0_39, %c0_40] : memref<1x1x4x8x128xf32, #tpu.memory_space<vmem>>, vector<1x1x1x8x128xf32>
    %95 = vector.shape_cast %94 : vector<1x1x1x8x128xf32> to vector<8x128xf32>
    %96 = vector.shape_cast %93 : vector<8x128xf32> to vector<1x1x1x8x128xf32>
    tpu.vector_store %arg5[%c0_36, %c0_37, %c0_38, %c0_39, %c0_40], %96 {strides = array<i32>} : memref<1x1x4x8x128xf32, #tpu.memory_space<vmem>>, vector<1x1x1x8x128xf32>,
    %c0_41 = arith.constant 0 : index
    %c0_42 = arith.constant 0 : index
    %c1 = arith.constant 1 : index
    %c0_43 = arith.constant 0 : index
    %c0_44 = arith.constant 0 : index
    %97 = vector.load %arg5[%c0_41, %c0_42, %c1, %c0_43, %c0_44] : memref<1x1x4x8x128xf32, #tpu.memory_space<vmem>>, vector<1x1x1x8x128xf32>
    %98 = vector.shape_cast %97 : vector<1x1x1x8x128xf32> to vector<8x128xf32>
    %99 = arith.addf %98, %56 : vector<8x128xf32>
    %c0_45 = arith.constant 0 : index
    %c0_46 = arith.constant 0 : index
    %c1_47 = arith.constant 1 : index
    %c0_48 = arith.constant 0 : index
    %c0_49 = arith.constant 0 : index
    %100 = vector.load %arg5[%c0_45, %c0_46, %c1_47, %c0_48, %c0_49] : memref<1x1x4x8x128xf32, #tpu.memory_space<vmem>>, vector<1x1x1x8x128xf32>
    %101 = vector.shape_cast %100 : vector<1x1x1x8x128xf32> to vector<8x128xf32>
    %102 = vector.shape_cast %99 : vector<8x128xf32> to vector<1x1x1x8x128xf32>
    tpu.vector_store %arg5[%c0_45, %c0_46, %c1_47, %c0_48, %c0_49], %102 {strides = array<i32>} : memref<1x1x4x8x128xf32, #tpu.memory_space<vmem>>, vector<1x1x1x8x128xf32>,
    %c0_50 = arith.constant 0 : index
    %c0_51 = arith.constant 0 : index
    %c2 = arith.constant 2 : index
    %c0_52 = arith.constant 0 : index
    %c0_53 = arith.constant 0 : index
    %103 = vector.load %arg5[%c0_50, %c0_51, %c2, %c0_52, %c0_53] : memref<1x1x4x8x128xf32, #tpu.memory_space<vmem>>, vector<1x1x1x8x128xf32>
    %104 = vector.shape_cast %103 : vector<1x1x1x8x128xf32> to vector<8x128xf32>
    %105 = arith.addf %104, %89 : vector<8x128xf32>
    %c0_54 = arith.constant 0 : index
    %c0_55 = arith.constant 0 : index
    %c2_56 = arith.constant 2 : index
    %c0_57 = arith.constant 0 : index
    %c0_58 = arith.constant 0 : index
    %106 = vector.load %arg5[%c0_54, %c0_55, %c2_56, %c0_57, %c0_58] : memref<1x1x4x8x128xf32, #tpu.memory_space<vmem>>, vector<1x1x1x8x128xf32>
    %107 = vector.shape_cast %106 : vector<1x1x1x8x128xf32> to vector<8x128xf32>
    %108 = vector.shape_cast %105 : vector<8x128xf32> to vector<1x1x1x8x128xf32>
    tpu.vector_store %arg5[%c0_54, %c0_55, %c2_56, %c0_57, %c0_58], %108 {strides = array<i32>} : memref<1x1x4x8x128xf32, #tpu.memory_space<vmem>>, vector<1x1x1x8x128xf32>,
    %c0_59 = arith.constant 0 : index
    %c0_60 = arith.constant 0 : index
    %c3 = arith.constant 3 : index
    %c0_61 = arith.constant 0 : index
    %c0_62 = arith.constant 0 : index
    %109 = vector.load %arg5[%c0_59, %c0_60, %c3, %c0_61, %c0_62] : memref<1x1x4x8x128xf32, #tpu.memory_space<vmem>>, vector<1x1x1x8x128xf32>
    %110 = vector.shape_cast %109 : vector<1x1x1x8x128xf32> to vector<8x128xf32>
    %111 = arith.mulf %59, %89 : vector<8x128xf32>
    %112 = arith.addf %110, %111 : vector<8x128xf32>
    %c0_63 = arith.constant 0 : index
    %c0_64 = arith.constant 0 : index
    %c3_65 = arith.constant 3 : index
    %c0_66 = arith.constant 0 : index
    %c0_67 = arith.constant 0 : index
    %113 = vector.load %arg5[%c0_63, %c0_64, %c3_65, %c0_66, %c0_67] : memref<1x1x4x8x128xf32, #tpu.memory_space<vmem>>, vector<1x1x1x8x128xf32>
    %114 = vector.shape_cast %113 : vector<1x1x1x8x128xf32> to vector<8x128xf32>
    %115 = vector.shape_cast %112 : vector<8x128xf32> to vector<1x1x1x8x128xf32>
    tpu.vector_store %arg5[%c0_63, %c0_64, %c3_65, %c0_66, %c0_67], %115 {strides = array<i32>} : memref<1x1x4x8x128xf32, #tpu.memory_space<vmem>>, vector<1x1x1x8x128xf32>,
    return
  }
  func.func @transform_0(%arg0: i32, %arg1: i32, %arg2: i32) -> (i32, i32, i32) {
    %c1_i32 = arith.constant 1 : i32
    %0 = arith.muli %arg1, %c1_i32 : i32
    %1 = arith.addi %0, %arg2 : i32
    %c0_i32 = arith.constant 0 : i32
    %c0_i32_0 = arith.constant 0 : i32
    return %arg0, %c0_i32, %1 : i32, i32, i32
  }
  func.func @transform_1(%arg0: i32, %arg1: i32, %arg2: i32) -> (i32, i32, i32) {
    %c1_i32 = arith.constant 1 : i32
    %0 = arith.muli %arg1, %c1_i32 : i32
    %1 = arith.addi %0, %arg2 : i32
    %c0_i32 = arith.constant 0 : i32
    %c0_i32_0 = arith.constant 0 : i32
    return %arg0, %c0_i32, %1 : i32, i32, i32
  }
  func.func @transform_2(%arg0: i32, %arg1: i32, %arg2: i32) -> (i32, i32, i32, i32, i32) {
    %c0_i32 = arith.constant 0 : i32
    %c0_i32_0 = arith.constant 0 : i32
    %c0_i32_1 = arith.constant 0 : i32
    %c0_i32_2 = arith.constant 0 : i32
    return %arg0, %arg1, %c0_i32, %c0_i32_0, %c0_i32_1 : i32, i32, i32, i32, i32
  }
}

</mosaic_0001>

<bundles_post_ra>
// kernel: tpu_custom_call.1
= control target key start
LH: loop header
LB: loop body
LE: loop exit
PB: predicated region body
PF: predicated region fallthrough
CT: control target
= control target key end

     0   :  { %7 = vsyncpa [#allocation4], 0  ;;  %s929_s0 = inlined_call_operand.vmem [shape: f32[2,15,256], index: 0, kind: input, shape index: {}]   ;;  %s930_s1 = inlined_call_operand.vmem [shape: s32[2,1,256], index: 1, kind: input, shape index: {}]   ;;  %s931_s2 = inlined_call_operand.hbm [shape: f32[2,2,4,8,128], index: 2, kind: output, shape index: {}]  }
   0x1   :  { %9 = vsyncpa [#allocation4 + $0x1], 0  ;;  %s765_s9 = smov 0   ;;  %s767_s10 = smov 0  }
   0x2   :  { %s769_s11 = smov 0   ;;  %s771_s12 = smov 0  }
   0x3   :  { %s773_s13 = smov 0   ;;  %s775_s14 = smov 0  }
   0x4   :  { %s777_s15 = smov 0   ;;  %s779_s16 = smov 0  }
   0x5 LB: > { %s530_s17 = sadd.s32 4294967295, %s741_s16   ;;  %s531_s18 = sadd.s32 4294967294, %s741_s16   ;;  %s741_s16 = sphi %s779_s16, %s15_s16   ;;  %s737_s15 = sphi %s777_s15, %s941_s15   ;;  %s733_s14 = sphi %s775_s14, %s940_s14   ;;  %s729_s13 = sphi %s773_s13, %s939_s13   ;;  %s725_s12 = sphi %s771_s12, %s938_s12   ;;  %s721_s11 = sphi %s769_s11, %s937_s11   ;;  %s717_s10 = sphi %s767_s10, %s936_s10   ;;  %s713_s9 = sphi %s765_s9, %s935_s9  }
   0x6   : > { %s30_s19 = sadd.s32 1, %s733_s14  ;;  %s34_s20 = sadd.s32 1, %s737_s15 }
   0x7   : > { %p32_p0 = scmp.ge.s32.totalorder %s30_s19, 2  ;;  %p52_p1 = scmp.ne.s32.totalorder %s721_s11, %s717_s10 }
   0x8   : > { %p53_p2 = scmp.eq.s32.totalorder %s741_s16, 0  ;;  %p114_p5 = scmp.eq.s32.totalorder %s530_s17, 3 }
   0x9   : > { %s943_s19 = smov (%p32_p0, %s30_s19), 0  ;;  %s945_s20 = smov (!%p32_p0, %s34_s20), %s737_s15 }
   0xa   : > { %s41_s21 = ssub.s32 %s733_s14, %s943_s19  ;;  %p817_p3 = por %p53_p2, %p52_p1 }
   0xb   : > { %p36_p4 = scmp.ge.s32.totalorder %s945_s20, 2  ;;  %p119_p6 = scmp.ne.s32.totalorder %s717_s10, %s713_s9 }
   0xc   : > { %p120_p7 = scmp.eq.s32.totalorder %s531_s18, 3  ;;  %p825_p8 = por %p114_p5, %p52_p1 }
   0xd   : > { %s947_s20 = smov (%p36_p4, %s945_s20), 0  ;;  %s45_s27 = sadd.s32 1, %s721_s11 }
   0xe   : > { %p829_p9 = por %p120_p7, %p119_p6  ;;  %s40_s25 = ssub.s32 %s737_s15, %s947_s20 }
   0xf   : > { %s42_s26 = sor.u32 %s41_s21, %s40_s25  ;;  %p533_p11 = scmp.ge.s32.totalorder %s741_s16, 4 }
  0x10   : > { %p43_p10 = scmp.eq.s32.totalorder %s42_s26, 0 }
  0x11   : > { %136 = sbr.rel (%p533_p11) target bundleno = 29 (0x1d), region = 16 }
  0x12   : > { %s837_s28 = scalar_select %p43_p10, %s721_s11, %s45_s27  }
  0x16   : > { %139 = sbr.rel (!%p817_p3) target bundleno = 29 (0x1d), region = 20  ;;  %s141_s29 = sand.u32 (%p817_p3), 1, %s721_s11  }
  0x17   : > { %s535_s30 = sshll.u32 (%p817_p3), %s737_s15, 2  ;;  %s534_s3 = sshll.u32 (%p817_p3), %s141_s29, 4 }
  0x18   : > { %s146_s4 = sadd.s32 (%p817_p3), %s733_s14, %s535_s30  ;;  %s143_s17 = scalar_lea.vmem (%p817_p3), [#allocation2], %s534_s3 }
  0x19   : > { %s536_s5 = sshll.u32 (%p817_p3), %s146_s4, 3 }
  0x1a   : > { %s148_s8 = scalar_lea.vmem (%p817_p3), %s929_s0, %s536_s5 }
  0x1b   : > { %v179_v0 = vld [vmem:[%s148_s8] sm:$0xff]  ;;  %v181_v1 = vld [vmem:[%s148_s8 + $0x10] sm:$0xff] }
  0x1c   : > { %180 = vst [vmem:[%s143_s17] sm:$0xff] %v179_v0  ;;  %182 = vst [vmem:[%s143_s17 + $0x8] sm:$0xff] %v181_v1 }
  0x1d PF: > { %p537_p12 = scmp.ge.s32.totalorder %s741_s16, 1  ;;  %p199_p13 = scmp.lt.s32.totalorder %s741_s16, 5 }
  0x1f   : > { %p200_p0 = pnand %p537_p12, %p199_p13 }
  0x20   : > { %s851_s18 = sand.u32 (!%p200_p0), 1, %s717_s10   ;;  %p237_p1 = scmp.lt.s32.totalorder (!%p200_p0), %s729_s13, 1 }
  0x21   : > { %203 = sbr.rel (%p200_p0) target bundleno = 323 (0x143), region = 62  ;;  %s538_s21 = sshll.u32 (!%p200_p0), %s851_s18, 4 }
  0x22   : > { %s208_s22 = scalar_lea.vmem (!%p200_p0), [#allocation2], %s538_s21  ;;  %p239_p2 = scmp.lt.s32.totalorder (!%p200_p0), %s725_s12, 1 }
  0x23   : > { %s539_s5 = sshll.u32 (!%p200_p0), %s851_s18, 5  ;;  %s551_s7 = sshll.u32 (!%p200_p0), %s725_s12, 2 }
  0x24   : > { %s862_s6 = scalar_lea.vmem (!%p200_p0), [#allocation3], %s539_s5  ;;  %s552_s8 = sshll.u32 (!%p200_p0), %s729_s13, 3 }
  0x25   : > { %s424_s17 = sadd.s32 (!%p200_p0), %s552_s8, %s551_s7 }
  0x26   : > { %v255_v2 = vlaneseq  ;;  %v743_v3 = vmov 0.0   ;;  %vm280_vm0 = vcmask 1046528   ;;  %vm744_vm1 = vmmov 0   ;;  %v254_v5 = vld [vmem:[%s208_s22 + $0x8] sm:$0x7f]  ;;  %v253_v6 = vld [vmem:[%s208_s22] sm:$0xff] }
  0x27   : > { %559 = vmatprep.subr.mxu0 %v743_v3  ;;  %563 = vmatprep.mubr.msk.f32.mxu0 %vm744_vm1, %v743_v3  ;;  %v745_v7 = vmov 0   ;;  %vm276_vm8 = vcmask 121856   ;;  %s238_s25 = scalar_select %p237_p1, %s729_s13, 1  ;;  %v746_v28 = vmov -1e+30  }
  0x28   : > { %v258_v4 = vand.u32 127, %v255_v2  ;;  %560 = vmatpush3.msk.msra.mxu0 %vm280_vm0, %v254_v5  ;;  %v256_v12 = vshrl.u32 %v255_v2, 7  ;;  %s240_s26 = scalar_select %p239_p2, %s725_s12, 1 }
  0x29   : > { %561 = vmatprep.subr.mxu0 %v743_v3  ;;  %s540_s27 = sshll.u32 %s238_s25, 1  ;;  %s553_s21 = sshll.u32 %s424_s17, 7 }
  0x2a   : > { %vm259_vm2 = vcmp.eq.s32.totalorder %v258_v4, 1  ;;  %vm261_vm3 = vcmp.eq.s32.totalorder %v258_v4, 5  ;;  %vm263_vm4 = vcmp.eq.s32.totalorder %v258_v4, 9  ;;  %vm265_vm5 = vcmp.eq.s32.totalorder %v258_v4, 14  ;;  %562 = vmatpush3.msra.mxu0 %v253_v6  ;;  %s242_s29 = sadd.s32 %s540_s27, %s240_s26  ;;  %s427_s22 = sshll.u32 %s862_s6, 4  ;;  %s875_s22 = int_to_ptr.vmem [resolvable:$true] %s427_s22 }
  0x2b   : > { %v260_v8 = vsel %vm259_vm2, 1, %v745_v7  ;;  %v262_v9 = vsel %vm261_vm3, 2, %v745_v7  ;;  %v264_v10 = vsel %vm263_vm4, 3, %v745_v7  ;;  %v266_v11 = vsel %vm265_vm5, 4, %v745_v7  ;;  %s243_s4 = scalar_lea.vmem %s930_s1, %s242_s29  ;;  %s873_s12 = scalar_lea.hbm %s931_s2, %s553_s21 }
  0x2c   : > { %v267_v13 = vadd.s32 %v262_v9, %v260_v8  ;;  %v268_v14 = vadd.s32 %v266_v11, %v264_v10  ;;  %vm271_vm6 = vcmp.lt.s32.totalorder %v258_v4, 15  ;;  %v375_v17 = vld [vmem:[%s243_s4] sm:$0x1]  ;;  %v389_v25 = vsub.s32 0, %v256_v12  ;;  %s412_s13 = scalar_lea.sflag [#allocation4], %s851_s18  ;;  %s649_s27 = scalar_lea.vmem %s875_s22, 512 }
  0x2d   : > { %vm376_vm10 = vcmp.eq.s32.totalorder %v375_v17, 1  ;;  %vm378_vm11 = vcmp.eq.s32.totalorder %v375_v17, 5  ;;  %vm380_vm12 = vcmp.eq.s32.totalorder %v375_v17, 9  ;;  %vm382_vm13 = vcmp.eq.s32.totalorder %v375_v17, 14  ;;  %p650_p3 = scmp.ne.s32.totalorder %s875_s22, %s649_s27  ;;  %s747_s29 = smov [#allocation3]  }
  0x2e   : > { %v269_v15 = vadd.s32 %v268_v14, %v267_v13  ;;  %v377_v18 = vsel %vm376_vm10, 1, %v745_v7  ;;  %v379_v19 = vsel %vm378_vm11, 2, %v745_v7  ;;  %v381_v20 = vsel %vm380_vm12, 3, %v745_v7  ;;  %s653_s30 = sshll.u32 %s747_s29, 4  ;;  %s654_s30 = int_to_ptr.vmem [resolvable:$false] %s653_s30 }
  0x2f   : > { %v383_v21 = vsel %vm382_vm13, 4, %v745_v7  ;;  %v384_v22 = vadd.s32 %v379_v19, %v377_v18  ;;  %vm274_vm15 = vcmp.lt.s32.totalorder %v256_v12, 5  ;;  %p651_p4 = pnand %p650_p3, %p825_p8  ;;  %s655_s3 = scalar_lea.vmem %s654_s30, 1024 }
  0x30   : > { %vm270_vm7 = vcmp.eq.s32.totalorder %v256_v12, %v269_v15  ;;  %v385_v23 = vadd.s32 %v383_v21, %v381_v20  ;;  %v275_v29 = vsel %vm274_vm15, 0.0, %v746_v28  ;;  %p656_p6 = scmp.lt.s32.totalorder %s875_s22, %s654_s30  ;;  %p657_p7 = scmp.lt.s32.totalorder %s655_s3, %s649_s27 }
  0x31   : > { %vm272_vm9 = vmand %vm270_vm7, %vm271_vm6  ;;  %p652_p5 = pneg %p651_p4 }
  0x32   : > { %v273_v16 = vsel %vm272_vm9, 1.0, %v743_v3  ;;  %v386_v24 = vadd.s32 %v385_v23, %v384_v22  ;;  %p658_p10 = por %p657_p7, %p656_p6 }
  0x33   : > { %564 = vmatmul.mubr.msk.f32.vlgmr.msra.gmra.mxu0 %vm276_vm8, %v273_v16 }
  0x34   : > { %v390_v26 = vrot.slane %v386_v24, %v389_v25  ;;  %p659_p11 = pnand %p658_p10, %p652_p5 }
  0x36   : > { %vm391_vm14 = vcmp.eq.s32.totalorder %v256_v12, %v390_v26 }
  0x37   : > { %v543_v27 = vsel %vm391_vm14, 1.0, %v743_v3 }
  0x38   : > { %547 = vst [vmem:[%s862_s6 + $0x10] sm:$0xff] %v543_v27 }
  0xf3   : > { %v350_v30 = vpop.f32.mrf.mxu0 }
  0xf4   : > { %v351_v31 = vadd.f32 %v350_v30, %v275_v29 }
  0xf5   : > { %v565_v32 = vpop.f32.mrf.mxu0 }
  0xf6   : > { %v354_v33 = vrot.slane %v351_v31, 4 }
  0xf8   : > { %v355_v34 = vmax.f32 %v351_v31, %v354_v33 }
  0xfa   : > { %v356_v35 = vrot.slane %v355_v34, 2 }
  0xfc   : > { %v357_v36 = vmax.f32 %v355_v34, %v356_v35 }
  0xfe   : > { %v358_v37 = vrot.slane %v357_v36, 1 }
 0x100   : > { %v359_v38 = vmax.f32 %v357_v36, %v358_v37 }
 0x102   : > { %v360_v39 = vsub.f32 %v351_v31, %v359_v38 }
 0x104   : > { %v361_v40 = vmul.f32 1.442695, %v360_v39 }
 0x106   : > { %643 = vpow2.f32 %v361_v40 }
 0x113   : > { %v644_v41 = vpop.eup %643 }
 0x114   : > { %v363_v42 = vrot.slane %v644_v41, 4 }
 0x116   : > { %v364_v43 = vadd.f32 %v644_v41, %v363_v42 }
 0x118   : > { %v365_v44 = vrot.slane %v364_v43, 2 }
 0x11a   : > { %v366_v45 = vadd.f32 %v365_v44, %v364_v43 }
 0x11c   : > { %v367_v46 = vrot.slane %v366_v45, 1 }
 0x11e   : > { %v368_v47 = vadd.f32 %v367_v46, %v366_v45 }
 0x120   : > { %645 = vrcp.f32 %v368_v47 }
 0x121   : > { %647 = vlog2.f32 %v368_v47 }
 0x12d   : > { %v646_v48 = vpop.eup %645 }
 0x12e   : > { %v648_v49 = vpop.eup %647  ;;  %v371_v50 = vmul.f32 %v646_v48, %v644_v41 }
 0x12f   : > { %v373_v51 = vmul.f32 0.6931472, %v648_v49 }
 0x130   : > { %v395_v52 = vmul.f32 %v543_v27, %v371_v50  ;;  %545 = vst [vmem:[%s862_s6 + $0x8] sm:$0xff] %v371_v50 }
 0x131   : > { %v374_v53 = vsub.f32 %v373_v51, %v360_v39 }
 0x132   : > { %397 = vst [vmem:[%s862_s6] sm:$0xff] %v395_v52 }
 0x133   : > { %v408_v54 = vmul.f32 %v543_v27, %v374_v53 }
 0x135   : > { %549 = vst [vmem:[%s862_s6 + $0x18] sm:$0xff] %v408_v54 }
 0x136   : > { %662 = shalt.err (!%p659_p11)
}
 0x137   : > { %s663_s4 = scalar_lea.hbm %s873_s12, 512  ;;  %s667_s7 = scalar_lea.hbm %s931_s2, 2048 }
 0x138   : > { %p664_p12 = scmp.ne.s32.totalorder %s873_s12, %s663_s4  ;;  %p668_p1 = scmp.lt.s32.totalorder %s873_s12, %s931_s2 }
 0x139   : > { %p669_p2 = scmp.lt.s32.totalorder %s667_s7, %s663_s4 }
 0x13a   : > { %p665_p13 = pnand %p664_p12, %p825_p8 }
 0x13b   : > { %p670_p3 = por %p669_p2, %p668_p1 }
 0x13c   : > { %p666_p0 = pneg %p665_p13 }
 0x13e   : > { %p671_p4 = pnand %p670_p3, %p666_p0 }
 0x140   : > { %674 = shalt.err (!%p671_p4)
}
 0x141   : > { %s748_s21 = smov 128   ;;  %s749_s25 = smov 8  }
 0x142   : > { %566 = dma.vmem_to_hbm [thread:$0]  (%p825_p8), %s875_s22, 512, %s873_s12, %s412_s13, %s748_s21, %s748_s21, %s749_s25  }
 0x143 PF: > { %p572_p5 = scmp.ge.s32.totalorder %s741_s16, 2  ;;  %s442_s26 = sand.u32 1, %s713_s9  }
 0x144   : > { %s443_s27 = scalar_lea.sflag [#allocation4], %s442_s26 }
 0x145   : > { %p569_p6 = pnand %p572_p5, %p829_p9 }
 0x147   : > { %p570_p7 = pneg %p569_p6 }
 0x149   : > { %708 = dma.done.wait (%p570_p7), %s443_s27, 512  }
 0x14a   : > { %710 = vsyncadd (%p570_p7), %s443_s27, 4294966784  ;;  %s15_s16 = sadd.s32 1, %s741_s16   ;;  %s935_s9 = smov %s717_s10 }
 0x14b   : > { %p12_p10 = scmp.ge.s32.totalorder %s15_s16, 6   ;;  %s936_s10 = smov %s721_s11 }
 0x14c   : > { %s937_s11 = smov %s837_s28  ;;  %s938_s12 = smov %s733_s14 }
 0x14d   : > { %s939_s13 = smov %s737_s15  ;;  %s940_s14 = smov %s943_s19 }
 0x14e   : > { %s941_s15 = smov %s947_s20  ;;  %14 = sbr.rel (!%p12_p10) target bundleno = 5 (0x5), region = 116 }
 0x153   :  { %448 = vsyncpa [#allocation4], 1 }
 0x154   :  { %450 = vsyncpa [#allocation4 + $0x1], 1 }

</bundles_post_ra>
